<compile_context>
chip_gen: v5e
topology: v5e:2x2
jax: 0.10.0
libtpu: 0.0.40
codegen_flags: <defaults>
</compile_context>

<pallas_src>
import jax
import jax.numpy as jnp
from jax.experimental import pallas as pl
from jax.experimental.pallas import tpu as pltpu

# Model dims (from the PyTorch module)
C_IN, C_OUT, KSIZE = 2, 4, 2
L_IN = 202                      # conv output length 201, 4*201 = 804
L_OUT = L_IN - KSIZE + 1        # 201
D_IN = C_IN * L_IN              # 404  (flattened, conv folded into linear-1)
H1, H2, NCLS = 512, 128, 7


def _mlp_kernel(x_ref,                      # (TB, 404)  bf16
                w1_ref, b1_ref,             # (404, 512) bf16, (1, 512) f32
                w2_ref, b2_ref,             # (512, 128) bf16, (1, 128) f32
                w3_ref, b3_ref,             # (128, 7)   bf16, (1, 7)   f32
                out_ref):                   # (TB, 7)    f32
    # Layer 1 (conv already folded in): (TB,404)@(404,512), f32 accumulate.
    h1 = jnp.dot(x_ref[...], w1_ref[...], preferred_element_type=jnp.float32)
    h1 = jnp.maximum(h1 + b1_ref[...], 0.0)

    # Layer 2: (TB,512)@(512,128) + ReLU
    h2 = jnp.dot(h1.astype(jnp.bfloat16), w2_ref[...],
                 preferred_element_type=jnp.float32)
    h2 = jnp.maximum(h2 + b2_ref[...], 0.0)

    # Layer 3: (TB,128)@(128,7) + Sigmoid
    h3 = jnp.dot(h2.astype(jnp.bfloat16), w3_ref[...],
                 preferred_element_type=jnp.float32)
    h3 = h3 + b3_ref[...]
    out_ref[...] = 1.0 / (1.0 + jnp.exp(-h3))


def prepare_params(params):
    """One-time (off hot path) fold of Conv1d into Linear-1 + weight re-layout."""
    wc, bc, w1, b1, w2, b2, w3, b3 = params
    w1r = w1.reshape(H1, C_OUT, L_OUT)                      # [h, co, t]

    # W_eff[ci, s, h] = sum_{co,k, t=s-k in [0,201)} wc[co,ci,k] * w1r[h,co,t]
    w_eff = jnp.zeros((C_IN, L_IN, H1), jnp.float32)
    for k in range(KSIZE):
        part = jnp.einsum('oc,hot->cth', wc[:, :, k], w1r)  # (C_IN, L_OUT, H1)
        w_eff = w_eff.at[:, k:k + L_OUT, :].add(part)
    w_eff = w_eff.reshape(D_IN, H1)                         # (404, 512)

    b_eff = b1 + jnp.einsum('o,hot->h', bc, w1r)            # (512,)

    return (
        w_eff.astype(jnp.bfloat16), b_eff.reshape(1, H1).astype(jnp.float32),
        w2.T.astype(jnp.bfloat16),  b2.reshape(1, H2).astype(jnp.float32),
        w3.T.astype(jnp.bfloat16),  b3.reshape(1, NCLS).astype(jnp.float32),
    )


def conv1d_model_forward(x, prepped):
    """x: (B, 2, 202) float32 -> (B, 7) float32."""
    w1e, b1e, w2t, b2r, w3t, b3r = prepped
    B = x.shape[0]

    # Lane-dense input: flat index = ci*202 + s (matches the fold above).
    x2d = x.reshape(B, D_IN).astype(jnp.bfloat16)

    # Batch tile: multiple of 8 sublanes, up to 512 rows per grid step.
    TB = min(512, ((B + 7) // 8) * 8)
    grid = (pl.cdiv(B, TB),)

    def xmap(i):
        return (i, 0)

    def wmap(i):                 # same block every step -> weights stay VMEM-resident
        return (0, 0)

    return pl.pallas_call(
        _mlp_kernel,
        out_shape=jax.ShapeDtypeStruct((B, NCLS), jnp.float32),
        grid=grid,
        in_specs=[
            pl.BlockSpec((TB, D_IN), xmap),
            pl.BlockSpec((D_IN, H1), wmap),
            pl.BlockSpec((1, H1), wmap),
            pl.BlockSpec((H1, H2), wmap),
            pl.BlockSpec((1, H2), wmap),
            pl.BlockSpec((H2, NCLS), wmap),
            pl.BlockSpec((1, NCLS), wmap),
        ],
        out_specs=pl.BlockSpec((TB, NCLS), xmap),
        compiler_params=pltpu.CompilerParams(
            dimension_semantics=("parallel",)),
    )(x2d, w1e, b1e, w2t, b2r, w3t, b3r)


def init_params(key):
    """Deterministic synthetic parameters (PyTorch-default-style uniform init)."""
    ks = jax.random.split(key, 8)

    def uni(k, shape, fan_in):
        bound = 1.0 / jnp.sqrt(jnp.float32(fan_in))
        return jax.random.uniform(k, shape, jnp.float32, -bound, bound)

    wc = uni(ks[0], (C_OUT, C_IN, KSIZE), C_IN * KSIZE)
    bc = uni(ks[1], (C_OUT,), C_IN * KSIZE)
    w1 = uni(ks[2], (H1, C_OUT * L_OUT), C_OUT * L_OUT)
    b1 = uni(ks[3], (H1,), C_OUT * L_OUT)
    w2 = uni(ks[4], (H2, H1), H1)
    b2 = uni(ks[5], (H2,), H1)
    w3 = uni(ks[6], (NCLS, H2), H2)
    b3 = uni(ks[7], (NCLS,), H2)
    return (wc, bc, w1, b1, w2, b2, w3, b3)


def reference_forward(x, params):
    """Pure-JAX f32 reference reproducing the PyTorch forward exactly."""
    wc, bc, w1, b1, w2, b2, w3, b3 = params
    B = x.shape[0]
    conv = jnp.stack(
        [
            sum(wc[co, ci, k] * x[:, ci, k:k + L_OUT]
                for ci in range(C_IN) for k in range(KSIZE)) + bc[co]
            for co in range(C_OUT)
        ],
        axis=1,
    )                                           # (B, 4, 201)
    flat = conv.reshape(B, -1)                  # (B, 804), index = co*201 + t
    h1 = jnp.maximum(flat @ w1.T + b1, 0.0)
    h2 = jnp.maximum(h1 @ w2.T + b2, 0.0)
    return jax.nn.sigmoid(h2 @ w3.T + b3)


if __name__ == "__main__":
    key = jax.random.PRNGKey(0)
    kx, kp = jax.random.split(key)
    x = jax.random.normal(kx, (2, C_IN, L_IN), dtype=jnp.float32)
    params = init_params(kp)

    prepped = prepare_params(params)            # one-time fold / re-layout
    out = conv1d_model_forward(x, prepped)
    out = jax.block_until_ready(out)

    ref = reference_forward(x, params)
    assert out.shape == (2, NCLS)
    # bf16 weights/activations (f32 accumulation) vs. f32 reference: relaxed tolerance.
    assert jnp.allclose(out, ref, atol=3e-2, rtol=3e-2), "mismatch vs reference"

    print("KERNEL_OK")
</pallas_src>

<mosaic_0001>
module attributes {stable_mosaic.version = 11 : i64} {
  func.func @_mlp_kernel(%arg0: i32, %arg1: memref<8x404xbf16, #tpu.memory_space<vmem>>, %arg2: memref<404x512xbf16, #tpu.memory_space<vmem>>, %arg3: memref<1x512xf32, #tpu.memory_space<vmem>>, %arg4: memref<512x128xbf16, #tpu.memory_space<vmem>>, %arg5: memref<1x128xf32, #tpu.memory_space<vmem>>, %arg6: memref<128x7xbf16, #tpu.memory_space<vmem>>, %arg7: memref<1x7xf32, #tpu.memory_space<vmem>>, %arg8: memref<8x7xf32, #tpu.memory_space<vmem>>) attributes {dimension_semantics = [#tpu.dimension_semantics<parallel>], iteration_bounds = array<i64: 1>, scalar_prefetch = 0 : i64, scratch_operands = 0 : i64, tpu.core_type = #tpu.core_type<tc>, window_params = [{transform_indices = @transform_0, window_bounds = array<i64: 8, 404>}, {pipeline_mode = #tpu.pipeline_mode<synchronous>, transform_indices = @transform_1, window_bounds = array<i64: 404, 512>}, {pipeline_mode = #tpu.pipeline_mode<synchronous>, transform_indices = @transform_2, window_bounds = array<i64: 1, 512>}, {pipeline_mode = #tpu.pipeline_mode<synchronous>, transform_indices = @transform_3, window_bounds = array<i64: 512, 128>}, {pipeline_mode = #tpu.pipeline_mode<synchronous>, transform_indices = @transform_4, window_bounds = array<i64: 1, 128>}, {pipeline_mode = #tpu.pipeline_mode<synchronous>, transform_indices = @transform_5, window_bounds = array<i64: 128, 7>}, {pipeline_mode = #tpu.pipeline_mode<synchronous>, transform_indices = @transform_6, window_bounds = array<i64: 1, 7>}, {transform_indices = @transform_7, window_bounds = array<i64: 8, 7>}]} {
    %c0 = arith.constant 0 : index
    %c0_0 = arith.constant 0 : index
    %0 = vector.load %arg1[%c0, %c0_0] : memref<8x404xbf16, #tpu.memory_space<vmem>>, vector<8x404xbf16>
    %c0_1 = arith.constant 0 : index
    %c0_2 = arith.constant 0 : index
    %1 = vector.load %arg2[%c0_1, %c0_2] : memref<404x512xbf16, #tpu.memory_space<vmem>>, vector<404x512xbf16>
    %cst = arith.constant dense<0.000000e+00> : vector<8x512xf32>
    %2 = tpu.matmul %0, %1, %cst {dimension_numbers = #tpu.dot_dimension_numbers<[1], [0], [0], [1], [0, 0, 1, 1], [], []>} : vector<8x404xbf16>, vector<404x512xbf16>, vector<8x512xf32> -> vector<8x512xf32>
    %c0_3 = arith.constant 0 : index
    %c0_4 = arith.constant 0 : index
    %3 = vector.load %arg3[%c0_3, %c0_4] : memref<1x512xf32, #tpu.memory_space<vmem>>, vector<1x512xf32>
    %4 = vector.broadcast %3 : vector<1x512xf32> to vector<8x512xf32>
    %5 = arith.addf %2, %4 : vector<8x512xf32>
    %cst_5 = arith.constant 0.000000e+00 : f32
    %6 = vector.broadcast %cst_5 : f32 to vector<8x512xf32>
    %7 = arith.maximumf %5, %6 : vector<8x512xf32>
    %8 = arith.truncf %7 : vector<8x512xf32> to vector<8x512xbf16>
    %c0_6 = arith.constant 0 : index
    %c0_7 = arith.constant 0 : index
    %9 = vector.load %arg4[%c0_6, %c0_7] : memref<512x128xbf16, #tpu.memory_space<vmem>>, vector<512x128xbf16>
    %cst_8 = arith.constant dense<0.000000e+00> : vector<8x128xf32>
    %10 = tpu.matmul %8, %9, %cst_8 {dimension_numbers = #tpu.dot_dimension_numbers<[1], [0], [0], [1], [0, 0, 1, 1], [], []>} : vector<8x512xbf16>, vector<512x128xbf16>, vector<8x128xf32> -> vector<8x128xf32>
    %c0_9 = arith.constant 0 : index
    %c0_10 = arith.constant 0 : index
    %11 = vector.load %arg5[%c0_9, %c0_10] : memref<1x128xf32, #tpu.memory_space<vmem>>, vector<1x128xf32>
    %12 = vector.broadcast %11 : vector<1x128xf32> to vector<8x128xf32>
    %13 = arith.addf %10, %12 : vector<8x128xf32>
    %cst_11 = arith.constant 0.000000e+00 : f32
    %14 = vector.broadcast %cst_11 : f32 to vector<8x128xf32>
    %15 = arith.maximumf %13, %14 : vector<8x128xf32>
    %16 = arith.truncf %15 : vector<8x128xf32> to vector<8x128xbf16>
    %c0_12 = arith.constant 0 : index
    %c0_13 = arith.constant 0 : index
    %17 = vector.load %arg6[%c0_12, %c0_13] : memref<128x7xbf16, #tpu.memory_space<vmem>>, vector<128x7xbf16>
    %cst_14 = arith.constant dense<0.000000e+00> : vector<8x7xf32>
    %18 = tpu.matmul %16, %17, %cst_14 {dimension_numbers = #tpu.dot_dimension_numbers<[1], [0], [0], [1], [0, 0, 1, 1], [], []>} : vector<8x128xbf16>, vector<128x7xbf16>, vector<8x7xf32> -> vector<8x7xf32>
    %c0_15 = arith.constant 0 : index
    %c0_16 = arith.constant 0 : index
    %19 = vector.load %arg7[%c0_15, %c0_16] : memref<1x7xf32, #tpu.memory_space<vmem>>, vector<1x7xf32>
    %20 = vector.broadcast %19 : vector<1x7xf32> to vector<8x7xf32>
    %21 = arith.addf %18, %20 : vector<8x7xf32>
    %cst_17 = arith.constant 0.000000e+00 : f32
    %22 = vector.broadcast %cst_17 : f32 to vector<8x7xf32>
    %23 = arith.subf %22, %21 : vector<8x7xf32>
    %24 = math.exp %23 : vector<8x7xf32>
    %cst_18 = arith.constant 1.000000e+00 : f32
    %25 = vector.broadcast %cst_18 : f32 to vector<8x7xf32>
    %26 = arith.addf %25, %24 : vector<8x7xf32>
    %cst_19 = arith.constant 1.000000e+00 : f32
    %27 = vector.broadcast %cst_19 : f32 to vector<8x7xf32>
    %28 = arith.divf %27, %26 : vector<8x7xf32>
    %c0_20 = arith.constant 0 : index
    %c0_21 = arith.constant 0 : index
    %29 = vector.load %arg8[%c0_20, %c0_21] : memref<8x7xf32, #tpu.memory_space<vmem>>, vector<8x7xf32>
    tpu.vector_store %arg8[%c0_20, %c0_21], %28 {strides = array<i32>} : memref<8x7xf32, #tpu.memory_space<vmem>>, vector<8x7xf32>,
    return
  }
  func.func @transform_0(%arg0: i32) -> (i32, i32) {
    %c0_i32 = arith.constant 0 : i32
    %c0_i32_0 = arith.constant 0 : i32
    return %arg0, %c0_i32 : i32, i32
  }
  func.func @transform_1(%arg0: i32) -> (i32, i32) {
    %c0_i32 = arith.constant 0 : i32
    %c0_i32_0 = arith.constant 0 : i32
    %c0_i32_1 = arith.constant 0 : i32
    return %c0_i32, %c0_i32_0 : i32, i32
  }
  func.func @transform_2(%arg0: i32) -> (i32, i32) {
    %c0_i32 = arith.constant 0 : i32
    %c0_i32_0 = arith.constant 0 : i32
    %c0_i32_1 = arith.constant 0 : i32
    return %c0_i32, %c0_i32_0 : i32, i32
  }
  func.func @transform_3(%arg0: i32) -> (i32, i32) {
    %c0_i32 = arith.constant 0 : i32
    %c0_i32_0 = arith.constant 0 : i32
    %c0_i32_1 = arith.constant 0 : i32
    return %c0_i32, %c0_i32_0 : i32, i32
  }
  func.func @transform_4(%arg0: i32) -> (i32, i32) {
    %c0_i32 = arith.constant 0 : i32
    %c0_i32_0 = arith.constant 0 : i32
    %c0_i32_1 = arith.constant 0 : i32
    return %c0_i32, %c0_i32_0 : i32, i32
  }
  func.func @transform_5(%arg0: i32) -> (i32, i32) {
    %c0_i32 = arith.constant 0 : i32
    %c0_i32_0 = arith.constant 0 : i32
    %c0_i32_1 = arith.constant 0 : i32
    return %c0_i32, %c0_i32_0 : i32, i32
  }
  func.func @transform_6(%arg0: i32) -> (i32, i32) {
    %c0_i32 = arith.constant 0 : i32
    %c0_i32_0 = arith.constant 0 : i32
    %c0_i32_1 = arith.constant 0 : i32
    return %c0_i32, %c0_i32_0 : i32, i32
  }
  func.func @transform_7(%arg0: i32) -> (i32, i32) {
    %c0_i32 = arith.constant 0 : i32
    %c0_i32_0 = arith.constant 0 : i32
    return %arg0, %c0_i32 : i32, i32
  }
}

</mosaic_0001>

<bundles_post_ra>
// kernel: tpu_custom_call.1
= control target key start
LH: loop header
LB: loop body
LE: loop exit
PB: predicated region body
PF: predicated region fallthrough
CT: control target
= control target key end

     0   :  { %12 = vsyncpa [#allocation3], 0  ;;  %s2314_s0 = inlined_call_operand.vmem [shape: bf16[2,404], index: 0, kind: input, shape index: {}]   ;;  %s2315_s1 = inlined_call_operand.hbm [shape: bf16[404,512], index: 1, kind: input, shape index: {}]   ;;  %s2316_s2 = inlined_call_operand.vmem [shape: f32[1,512], index: 2, kind: input, shape index: {}]   ;;  %s2317_s3 = inlined_call_operand.hbm [shape: bf16[512,128], index: 3, kind: input, shape index: {}]   ;;  %s2318_s4 = inlined_call_operand.vmem [shape: f32[1,128], index: 4, kind: input, shape index: {}]   ;;  %s2319_s5 = inlined_call_operand.vmem [shape: bf16[128,7], index: 5, kind: input, shape index: {}]   ;;  %s2320_s6 = inlined_call_operand.vmem [shape: f32[1,7], index: 6, kind: input, shape index: {}]   ;;  %s2321_s7 = inlined_call_operand.hbm [shape: f32[2,7], index: 7, kind: output, shape index: {}]  }
   0x1   :  { %13 = vsyncpa [#allocation6], 0 }
   0x2   :  { %14 = vsyncpa [#allocation4], 0  ;;  %s21_s26 = sshll.u32 %s2315_s1, 4  ;;  %s2169_s27 = smov [#allocation2]   ;;  %s22_s26 = int_to_ptr.hbm [resolvable:$true] %s21_s26 }
   0x3   :  { %s23_s28 = sshll.u32 %s2169_s27, 4  ;;  %s36_s8 = sshll.u32 %s2317_s3, 4  ;;  %s24_s28 = int_to_ptr.vmem [resolvable:$true] %s23_s28  ;;  %s37_s8 = int_to_ptr.hbm [resolvable:$true] %s36_s8 }
   0x4   :  { %s2170_s9 = smov 256   ;;  %s2171_s10 = smov 16  }
   0x5   :  { %29 = dma.hbm_to_vmem [thread:$0]  %s22_s26, 13056, %s24_s28, [#allocation3], %s2170_s9, %s2170_s9, %s2171_s10  }
   0x6   :  { %s2172_s11 = smov [#allocation5]   ;;  %s2173_s13 = smov 64  }
   0x7   :  { %s38_s12 = sshll.u32 %s2172_s11, 4  ;;  %s2174_s14 = smov 4   ;;  %s39_s12 = int_to_ptr.vmem [resolvable:$true] %s38_s12 }
   0x8   :  { %44 = dma.hbm_to_vmem [thread:$0]  %s37_s8, 4096, %s39_s12, [#allocation6], %s2173_s13, %s2173_s13, %s2174_s14  }
   0x9   :  { %2163 = dma.done.wait [#allocation3], 13056  }
   0xa   :  { %2164 = vsyncadd [#allocation3], 4294954240 }
   0xb   :  { %2165 = dma.done.wait [#allocation6], 4096  }
   0xc   :  { %2166 = vsyncadd [#allocation6], 4294963200  ;;  %v1486_v0 = vld [vmem:[#allocation2 + $0xe0] sm:$0xf]  ;;  %v1966_v1 = vld [vmem:[#allocation2 + $0xec] sm:$0xf0] }
   0xd   :  { %v1742_v2 = vld [vmem:[#allocation2 + $0x2e0] sm:$0xf]  ;;  %v1487_v3 = vor.u32 %v1966_v1, %v1486_v0  ;;  %v2030_v4 = vld [vmem:[#allocation2 + $0x2ec] sm:$0xf0]  ;;  %v1964_v5 = vld [vmem:[#allocation2 + $0xe4] sm:$0xf] }
   0xe   :  { %v1488_v6 = vld [vmem:[#allocation2 + $0xf0] sm:$0xf0]  ;;  %v1743_v7 = vor.u32 %v2030_v4, %v1742_v2  ;;  %v1470_v9 = vld [vmem:[#allocation2 + $0xc0] sm:$0xf]  ;;  %v1962_v10 = vld [vmem:[#allocation2 + $0xcc] sm:$0xf0] }
   0xf   :  { %v1491_v8 = vor.u32 %v1964_v5, %v1488_v6  ;;  %v1614_v11 = vld [vmem:[#allocation2 + $0x1e0] sm:$0xf]  ;;  %720 = vmatpush.bf16.msra.mxu0 %v1487_v3  ;;  %v1471_v12 = vor.u32 %v1962_v10, %v1470_v9  ;;  %v1998_v13 = vld [vmem:[#allocation2 + $0x1ec] sm:$0xf0]  ;;  %v1960_v18 = vld [vmem:[#allocation2 + $0xc4] sm:$0xf] }
  0x10   :  { %v1726_v14 = vld [vmem:[#allocation2 + $0x2c0] sm:$0xf]  ;;  %v2026_v15 = vld [vmem:[#allocation2 + $0x2cc] sm:$0xf0]  ;;  %746 = vmatpush.bf16.msra.mxu2 %v1743_v7  ;;  %v1615_v16 = vor.u32 %v1998_v13, %v1614_v11  ;;  %v1472_v19 = vld [vmem:[#allocation2 + $0xd0] sm:$0xf0] }
  0x11   :  { %772 = vmatpush.bf16.msra.mxu3 %v1491_v8  ;;  %v1727_v17 = vor.u32 %v2026_v15, %v1726_v14  ;;  %v1454_v20 = vld [vmem:[#allocation2 + $0xa0] sm:$0xf]  ;;  %v1475_v21 = vor.u32 %v1960_v18, %v1472_v19  ;;  %v1958_v22 = vld [vmem:[#allocation2 + $0xac] sm:$0xf0]  ;;  %v1956_v28 = vld [vmem:[#allocation2 + $0xa4] sm:$0xf] }
  0x12   :  { %v1598_v23 = vld [vmem:[#allocation2 + $0x1c0] sm:$0xf]  ;;  %v1994_v24 = vld [vmem:[#allocation2 + $0x1cc] sm:$0xf0]  ;;  %733 = vmatpush.bf16.msra.mxu1 %v1615_v16  ;;  %v1455_v29 = vor.u32 %v1958_v22, %v1454_v20  ;;  %v1456_v30 = vld [vmem:[#allocation2 + $0xb0] sm:$0xf0] }
  0x13   :  { %v1599_v25 = vor.u32 %v1994_v24, %v1598_v23  ;;  %v1710_v26 = vld [vmem:[#allocation2 + $0x2a0] sm:$0xf]  ;;  %v2022_v27 = vld [vmem:[#allocation2 + $0x2ac] sm:$0xf0]  ;;  %721 = vmatpush.bf16.msra.mxu0 %v1471_v12  ;;  %v1459_v34 = vor.u32 %v1956_v28, %v1456_v30  ;;  %v1952_v39 = vld [vmem:[#allocation2 + $0x84] sm:$0xf] }
  0x14   :  { %v1438_v31 = vld [vmem:[#allocation2 + $0x80] sm:$0xf]  ;;  %v1954_v32 = vld [vmem:[#allocation2 + $0x8c] sm:$0xf0]  ;;  %747 = vmatpush.bf16.msra.mxu2 %v1727_v17  ;;  %v1711_v33 = vor.u32 %v2022_v27, %v1710_v26  ;;  %v1440_v40 = vld [vmem:[#allocation2 + $0x90] sm:$0xf0] }
  0x15   :  { %773 = vmatpush.bf16.msra.mxu3 %v1475_v21  ;;  %v1582_v35 = vld [vmem:[#allocation2 + $0x1a0] sm:$0xf]  ;;  %v1990_v36 = vld [vmem:[#allocation2 + $0x1ac] sm:$0xf0]  ;;  %v1439_v42 = vor.u32 %v1954_v32, %v1438_v31  ;;  %v1443_v46 = vor.u32 %v1952_v39, %v1440_v40  ;;  %v1948_v51 = vld [vmem:[#allocation2 + $0x64] sm:$0xf] }
  0x16   :  { %v1694_v37 = vld [vmem:[#allocation2 + $0x280] sm:$0xf]  ;;  %v2018_v38 = vld [vmem:[#allocation2 + $0x28c] sm:$0xf0]  ;;  %734 = vmatpush.bf16.msra.mxu1 %v1599_v25  ;;  %v1583_v41 = vor.u32 %v1990_v36, %v1582_v35  ;;  %v1424_v52 = vld [vmem:[#allocation2 + $0x70] sm:$0xf0] }
  0x17   :  { %722 = vmatpush.bf16.msra.mxu0 %v1455_v29  ;;  %v1566_v43 = vld [vmem:[#allocation2 + $0x180] sm:$0xf]  ;;  %v1986_v44 = vld [vmem:[#allocation2 + $0x18c] sm:$0xf0]  ;;  %v1695_v45 = vor.u32 %v2018_v38, %v1694_v37  ;;  %v1427_v58 = vor.u32 %v1948_v51, %v1424_v52  ;;  %v1944_v63 = vld [vmem:[#allocation2 + $0x44] sm:$0xf] }
  0x18   :  { %748 = vmatpush.bf16.msra.mxu2 %v1711_v33  ;;  %v1422_v47 = vld [vmem:[#allocation2 + $0x60] sm:$0xf]  ;;  %v1950_v48 = vld [vmem:[#allocation2 + $0x6c] sm:$0xf0]  ;;  %v1567_v53 = vor.u32 %v1986_v44, %v1566_v43  ;;  %v1408_v0 = vld [vmem:[#allocation2 + $0x50] sm:$0xf0] }
  0x19   :  { %774 = vmatpush.bf16.msra.mxu3 %v1459_v34  ;;  %v1678_v49 = vld [vmem:[#allocation2 + $0x260] sm:$0xf]  ;;  %v2014_v50 = vld [vmem:[#allocation2 + $0x26c] sm:$0xf0]  ;;  %v1423_v54 = vor.u32 %v1950_v48, %v1422_v47  ;;  %vm707_vm0 = vcmask 1041408   ;;  %v1411_v8 = vor.u32 %v1944_v63, %v1408_v0  ;;  %vm704_vm1 = vcmask 162816  }
  0x1a   :  { %735 = vmatpush.bf16.msra.mxu1 %v1583_v41  ;;  %v1550_v55 = vld [vmem:[#allocation2 + $0x160] sm:$0xf]  ;;  %v1982_v56 = vld [vmem:[#allocation2 + $0x16c] sm:$0xf0]  ;;  %v1679_v57 = vor.u32 %v2014_v50, %v1678_v49  ;;  %v1940_v12 = vld [vmem:[#allocation2 + $0x24] sm:$0xf] }
  0x1b   :  { %723 = vmatpush.bf16.msra.mxu0 %v1439_v42  ;;  %v1406_v59 = vld [vmem:[#allocation2 + $0x40] sm:$0xf]  ;;  %v1946_v60 = vld [vmem:[#allocation2 + $0x4c] sm:$0xf0]  ;;  %v1551_v1 = vor.u32 %v1982_v56, %v1550_v55  ;;  %v1392_v13 = vld [vmem:[#allocation2 + $0x30] sm:$0xf0] }
  0x1c   :  { %749 = vmatpush.bf16.msra.mxu2 %v1695_v45  ;;  %v1662_v61 = vld [vmem:[#allocation2 + $0x240] sm:$0xf]  ;;  %v2010_v62 = vld [vmem:[#allocation2 + $0x24c] sm:$0xf0]  ;;  %v1407_v3 = vor.u32 %v1946_v60, %v1406_v59  ;;  %v60_v16 = vld [vmem:[%s2314_s0] sm:$0xf]  ;;  %v1395_v27 = vor.u32 %v1940_v12, %v1392_v13 }
  0x1d   :  { %775 = vmatpush.bf16.msra.mxu3 %v1443_v46  ;;  %v1390_v2 = vld [vmem:[#allocation2 + $0x20] sm:$0xf]  ;;  %v1942_v4 = vld [vmem:[#allocation2 + $0x2c] sm:$0xf0]  ;;  %v1663_v7 = vor.u32 %v2010_v62, %v1662_v61  ;;  %v61_v21 = vld [vmem:[%s2314_s0 + $0x4] sm:$0xf] }
  0x1e   :  { %736 = vmatpush.bf16.msra.mxu1 %v1567_v53  ;;  %v1534_v5 = vld [vmem:[#allocation2 + $0x140] sm:$0xf]  ;;  %v1978_v6 = vld [vmem:[#allocation2 + $0x14c] sm:$0xf0]  ;;  %v1391_v23 = vor.u32 %v1942_v4, %v1390_v2  ;;  %v63_v26 = vld [vmem:[%s2314_s0 + $0xc] sm:$0xf] }
  0x1f   :  { %724 = vmatpush.bf16.msra.mxu0 %v1423_v54  ;;  %v1646_v9 = vld [vmem:[#allocation2 + $0x220] sm:$0xf]  ;;  %v2006_v10 = vld [vmem:[#allocation2 + $0x22c] sm:$0xf0]  ;;  %v1535_v17 = vor.u32 %v1978_v6, %v1534_v5  ;;  %177 = vst [vmem:[#allocation1] ss:$9 sm:$0xff] %v60_v16 }
  0x20   :  { %750 = vmatpush.bf16.msra.mxu2 %v1679_v57  ;;  %v164_v11 = vld [vmem:[#allocation2 + $0x320] sm:$0x33]  ;;  %v1938_v19 = vld [vmem:[#allocation2 + $0xc] sm:$0xf0]  ;;  %v1647_v24 = vor.u32 %v2006_v10, %v1646_v9  ;;  %180 = vst [vmem:[#allocation1 + $0x1] ss:$9 sm:$0xff] %v61_v21 }
  0x21   :  { %776 = vmatpush.bf16.msra.mxu3 %v1427_v58  ;;  %v496_v14 = vunpack.c.l.b16 %v164_v11  ;;  %v497_v15 = vunpack.c.h.b16 %v164_v11  ;;  %v1374_v18 = vld [vmem:[#allocation2] sm:$0xf]  ;;  %v1974_v25 = vld [vmem:[#allocation2 + $0x12c] sm:$0xf0]  ;;  %v1936_v32 = vld [vmem:[#allocation2 + $0x4] sm:$0xf] }
  0x22   :  { %737 = vmatpush.bf16.msra.mxu1 %v1551_v1  ;;  %v1518_v20 = vld [vmem:[#allocation2 + $0x120] sm:$0xf]  ;;  %v2002_v29 = vld [vmem:[#allocation2 + $0x20c] sm:$0xf0]  ;;  %v1376_v33 = vld [vmem:[#allocation2 + $0x10] sm:$0xf0]  ;;  %v1375_v37 = vor.u32 %v1938_v19, %v1374_v18 }
  0x23   :  { %v62_v22 = vld [vmem:[%s2314_s0 + $0x8] sm:$0xf]  ;;  %725 = vmatpush.bf16.msra.mxu0 %v1407_v3  ;;  %v600_v30 = vpack.c.b16 %v496_v14, %v496_v14  ;;  %v601_v31 = vpack.c.b16 %v497_v15, %v497_v15  ;;  %v1519_v34 = vor.u32 %v1974_v25, %v1518_v20  ;;  %v1494_v35 = vld [vmem:[#allocation2 + $0xe8] sm:$0xf]  ;;  %v1967_v36 = vld [vmem:[#allocation2 + $0xf4] sm:$0xf0]  ;;  %v1379_v46 = vor.u32 %v1936_v32, %v1376_v33 }
  0x24   :  { %751 = vmatpush.bf16.msra.mxu2 %v1663_v7  ;;  %v1630_v28 = vld [vmem:[#allocation2 + $0x200] sm:$0xf]  ;;  %183 = vst [vmem:[#allocation1 + $0x2] ss:$9 sm:$0xff] %v62_v22  ;;  %v1970_v39 = vld [vmem:[#allocation2 + $0x10c] sm:$0xf0]  ;;  %v1495_v50 = vor.u32 %v1967_v36, %v1494_v35 }
  0x25   :  { %777 = vmatpush.bf16.msra.mxu3 %v1411_v8  ;;  %186 = vst [vmem:[#allocation1 + $0x3] ss:$9 sm:$0xff] %v63_v26  ;;  %v1502_v38 = vld [vmem:[#allocation2 + $0x100] sm:$0xf]  ;;  %v1631_v41 = vor.u32 %v2002_v29, %v1630_v28  ;;  %v709_v42 = vsel %vm707_vm0, %v600_v30, 0  ;;  %v712_v43 = vsel %vm707_vm0, %v601_v31, 0 }
  0x26   :  { %738 = vmatpush.bf16.msra.mxu1 %v1535_v17  ;;  %v1758_v40 = vld [vmem:[#allocation2 + $0x300] sm:$0xf]  ;;  %v2034_v44 = vld [vmem:[#allocation2 + $0x30c] sm:$0xf0]  ;;  %v2028_v45 = vld [vmem:[#allocation2 + $0x2e4] sm:$0xf]  ;;  %v1503_v54 = vor.u32 %v1970_v39, %v1502_v38 }
  0x27   :  { %726 = vmatpush.bf16.msra.mxu0 %v1391_v23  ;;  %v1744_v47 = vld [vmem:[#allocation2 + $0x2f0] sm:$0xf0]  ;;  %v2032_v48 = vld [vmem:[#allocation2 + $0x304] sm:$0xf]  ;;  %v1478_v53 = vld [vmem:[#allocation2 + $0xc8] sm:$0xf]  ;;  %v1759_v58 = vor.u32 %v2034_v44, %v1758_v40 }
  0x28   :  { %752 = vmatpush.bf16.msra.mxu2 %v1647_v24  ;;  %v1760_v49 = vld [vmem:[#allocation2 + $0x310] sm:$0xf0]  ;;  %v1996_v51 = vld [vmem:[#allocation2 + $0x1e4] sm:$0xf]  ;;  %v1963_v55 = vld [vmem:[#allocation2 + $0xd4] sm:$0xf0]  ;;  %v1747_v59 = vor.u32 %v2028_v45, %v1744_v47 }
  0x29   :  { %778 = vmatpush.bf16.msra.mxu3 %v1395_v27  ;;  %v1616_v52 = vld [vmem:[#allocation2 + $0x1f0] sm:$0xf0]  ;;  %v1622_v56 = vld [vmem:[#allocation2 + $0x1e8] sm:$0xf]  ;;  %v1999_v57 = vld [vmem:[#allocation2 + $0x1f4] sm:$0xf0]  ;;  %v1763_v63 = vor.u32 %v2032_v48, %v1760_v49  ;;  %v1479_v2 = vor.u32 %v1963_v55, %v1478_v53 }
  0x2a   :  { %739 = vmatpush.bf16.msra.mxu1 %v1519_v34  ;;  %v2024_v60 = vld [vmem:[#allocation2 + $0x2c4] sm:$0xf]  ;;  %v1619_v0 = vor.u32 %v1996_v51, %v1616_v52  ;;  %v1728_v1 = vld [vmem:[#allocation2 + $0x2d0] sm:$0xf0]  ;;  %v1623_v3 = vor.u32 %v1999_v57, %v1622_v56  ;;  %v1462_v6 = vld [vmem:[#allocation2 + $0xa8] sm:$0xf] }
  0x2b   :  { %727 = vmatpush.bf16.msra.mxu0 %v1375_v37  ;;  %v1992_v4 = vld [vmem:[#allocation2 + $0x1c4] sm:$0xf]  ;;  %v1600_v5 = vld [vmem:[#allocation2 + $0x1d0] sm:$0xf0]  ;;  %v1959_v7 = vld [vmem:[#allocation2 + $0xb4] sm:$0xf0]  ;;  %v1731_v11 = vor.u32 %v2024_v60, %v1728_v1 }
  0x2c   :  { %753 = vmatpush.bf16.msra.mxu2 %v1631_v41  ;;  %v2238_v61 = vld [vmem:[#allocation1] sm:$0xff]  ;;  %v2240_v62 = vld [vmem:[#allocation1 + $0x12] sm:$0xff]  ;;  %v2244_v10 = vld [vmem:[#allocation1 + $0x9] sm:$0xff]  ;;  %v1603_v12 = vor.u32 %v1992_v4, %v1600_v5  ;;  %v1463_v15 = vor.u32 %v1959_v7, %v1462_v6  ;;  %vm1350_vm5 = vcmask 56320  }
  0x2d   :  { %779 = vmatpush.bf16.msra.mxu3 %v1379_v46  ;;  %v1606_v8 = vld [vmem:[#allocation2 + $0x1c8] sm:$0xf]  ;;  %v1995_v9 = vld [vmem:[#allocation2 + $0x1d4] sm:$0xf0]  ;;  %v2020_v13 = vld [vmem:[#allocation2 + $0x2a4] sm:$0xf] }
  0x2e   :  { %728 = vmatmul.bf16.vlgmr.msra.gmra.mxu0 %v2238_v61  ;;  %740 = vmatpush.bf16.msra.mxu1 %v1503_v54  ;;  %v1712_v14 = vld [vmem:[#allocation2 + $0x2b0] sm:$0xf0]  ;;  %v1607_v16 = vor.u32 %v1995_v9, %v1606_v8  ;;  %v1988_v17 = vld [vmem:[#allocation2 + $0x1a4] sm:$0xf]  ;;  %v1446_v19 = vld [vmem:[#allocation2 + $0x88] sm:$0xf] }
  0x2f   :  { %765 = vmatpush.bf16.msrb.mxu0 %v709_v42  ;;  %754 = vmatmul.bf16.vlgmr.msra.gmra.mxu2 %v2240_v62  ;;  %v1584_v18 = vld [vmem:[#allocation2 + $0x1b0] sm:$0xf0]  ;;  %v1955_v20 = vld [vmem:[#allocation2 + $0x94] sm:$0xf0]  ;;  %v1590_v21 = vld [vmem:[#allocation2 + $0x1a8] sm:$0xf]  ;;  %v1715_v23 = vor.u32 %v2020_v13, %v1712_v14 }
  0x30   :  { %817 = vmatpush.bf16.msrb.mxu2 %v712_v43  ;;  %v1991_v22 = vld [vmem:[#allocation2 + $0x1b4] sm:$0xf0]  ;;  %780 = vmatmul.bf16.vlgmr.msra.gmra.mxu3 %v2238_v61  ;;  %v1587_v24 = vor.u32 %v1988_v17, %v1584_v18  ;;  %v2016_v25 = vld [vmem:[#allocation2 + $0x284] sm:$0xf]  ;;  %v1696_v26 = vld [vmem:[#allocation2 + $0x290] sm:$0xf0]  ;;  %v1447_v27 = vor.u32 %v1955_v20, %v1446_v19 }
  0x31   :  { %824 = vmatpush.bf16.msrb.mxu3 %v1495_v50  ;;  %741 = vmatmul.bf16.vlgmr.msra.gmra.mxu1 %v2244_v10  ;;  %v1591_v28 = vor.u32 %v1991_v22, %v1590_v21  ;;  %v1984_v29 = vld [vmem:[#allocation2 + $0x184] sm:$0xf]  ;;  %v1568_v30 = vld [vmem:[#allocation2 + $0x190] sm:$0xf0]  ;;  %v1430_v31 = vld [vmem:[#allocation2 + $0x68] sm:$0xf]  ;;  %v1699_v35 = vor.u32 %v2016_v25, %v1696_v26 }
  0x32   :  { %798 = vmatpush.bf16.msrb.mxu1 %v1747_v59  ;;  %v1951_v32 = vld [vmem:[#allocation2 + $0x74] sm:$0xf0]  ;;  %v1574_v33 = vld [vmem:[#allocation2 + $0x188] sm:$0xf]  ;;  %v1571_v36 = vor.u32 %v1984_v29, %v1568_v30  ;;  %v2012_v37 = vld [vmem:[#allocation2 + $0x264] sm:$0xf] }
  0x33   :  { %766 = vmatpush.bf16.msrb.mxu0 %v1759_v58  ;;  %v1987_v34 = vld [vmem:[#allocation2 + $0x194] sm:$0xf0]  ;;  %v1680_v38 = vld [vmem:[#allocation2 + $0x270] sm:$0xf0]  ;;  %v1431_v39 = vor.u32 %v1951_v32, %v1430_v31  ;;  %v1980_v41 = vld [vmem:[#allocation2 + $0x164] sm:$0xf] }
  0x34   :  { %818 = vmatpush.bf16.msrb.mxu2 %v1763_v63  ;;  %v1575_v40 = vor.u32 %v1987_v34, %v1574_v33  ;;  %v1552_v42 = vld [vmem:[#allocation2 + $0x170] sm:$0xf0]  ;;  %v1414_v43 = vld [vmem:[#allocation2 + $0x48] sm:$0xf]  ;;  %v1947_v44 = vld [vmem:[#allocation2 + $0x54] sm:$0xf0]  ;;  %v1683_v48 = vor.u32 %v2012_v37, %v1680_v38 }
  0x35   :  { %825 = vmatpush.bf16.msrb.mxu3 %v1479_v2  ;;  %v1558_v45 = vld [vmem:[#allocation2 + $0x168] sm:$0xf]  ;;  %v1983_v46 = vld [vmem:[#allocation2 + $0x174] sm:$0xf0]  ;;  %v1555_v49 = vor.u32 %v1980_v41, %v1552_v42  ;;  %v2008_v50 = vld [vmem:[#allocation2 + $0x244] sm:$0xf]  ;;  %v1415_v53 = vor.u32 %v1947_v44, %v1414_v43 }
  0x36   :  { %799 = vmatpush.bf16.msrb.mxu1 %v1731_v11  ;;  %v2248_v47 = vld [vmem:[#allocation1 + $0x1b] sm:$0xff]  ;;  %v1976_v52 = vld [vmem:[#allocation2 + $0x144] sm:$0xf]  ;;  %v1559_v54 = vor.u32 %v1983_v46, %v1558_v45  ;;  %v1398_v56 = vld [vmem:[#allocation2 + $0x28] sm:$0xf] }
  0x37   :  { %785 = vmatpush.bf16.msra.mxu0 %v1619_v0  ;;  %v1664_v51 = vld [vmem:[#allocation2 + $0x250] sm:$0xf0]  ;;  %v1943_v57 = vld [vmem:[#allocation2 + $0x34] sm:$0xf0]  ;;  %v1542_v58 = vld [vmem:[#allocation2 + $0x148] sm:$0xf] }
  0x38   :  { %837 = vmatpush.bf16.msra.mxu2 %v1623_v3  ;;  %v1536_v55 = vld [vmem:[#allocation2 + $0x150] sm:$0xf0]  ;;  %v1979_v59 = vld [vmem:[#allocation2 + $0x154] sm:$0xf0]  ;;  %v2254_v60 = vld [vmem:[#allocation2 + $0x328] sm:$0x33]  ;;  %v1667_v63 = vor.u32 %v2008_v50, %v1664_v51  ;;  %v1399_v3 = vor.u32 %v1943_v57, %v1398_v56 }
  0x39   :  { %826 = vmatpush.bf16.msrb.mxu3 %v1463_v15  ;;  %v1539_v0 = vor.u32 %v1976_v52, %v1536_v55  ;;  %v2004_v1 = vld [vmem:[#allocation2 + $0x224] sm:$0xf]  ;;  %v1648_v2 = vld [vmem:[#allocation2 + $0x230] sm:$0xf0]  ;;  %v1543_v4 = vor.u32 %v1979_v59, %v1542_v58  ;;  %v1382_v7 = vld [vmem:[#allocation2 + $0x8] sm:$0xf]  ;;  %v498_v8 = vunpack.c.l.b16 %v2254_v60 }
  0x3a   :  { %800 = vmatpush.bf16.msrb.mxu1 %v1715_v23  ;;  %v1972_v5 = vld [vmem:[#allocation2 + $0x124] sm:$0xf]  ;;  %v1520_v6 = vld [vmem:[#allocation2 + $0x130] sm:$0xf0]  ;;  %v1939_v9 = vld [vmem:[#allocation2 + $0x14] sm:$0xf0]  ;;  %v1651_v13 = vor.u32 %v2004_v1, %v1648_v2 }
  0x3b   :  { %786 = vmatpush.bf16.msra.mxu0 %v1603_v12  ;;  %v1526_v11 = vld [vmem:[#allocation2 + $0x128] sm:$0xf]  ;;  %v1975_v12 = vld [vmem:[#allocation2 + $0x134] sm:$0xf0]  ;;  %v1965_v14 = vld [vmem:[#allocation2 + $0xec] sm:$0xf]  ;;  %v1383_v20 = vor.u32 %v1939_v9, %v1382_v7  ;;  %v602_v25 = vpack.c.b16 %v498_v8, %v498_v8 }
  0x3c   :  { %838 = vmatpush.bf16.msra.mxu2 %v1607_v16  ;;  %v1496_v15 = vld [vmem:[#allocation2 + $0xf8] sm:$0xf0]  ;;  %v1523_v16 = vor.u32 %v1972_v5, %v1520_v6  ;;  %v2000_v17 = vld [vmem:[#allocation2 + $0x204] sm:$0xf]  ;;  %v1632_v18 = vld [vmem:[#allocation2 + $0x210] sm:$0xf0]  ;;  %v1527_v21 = vor.u32 %v1975_v12, %v1526_v11 }
  0x3d   :  { %827 = vmatpush.bf16.msrb.mxu3 %v1447_v27  ;;  %v1968_v19 = vld [vmem:[#allocation2 + $0x104] sm:$0xf]  ;;  %v1504_v22 = vld [vmem:[#allocation2 + $0x110] sm:$0xf0]  ;;  %v1510_v23 = vld [vmem:[#allocation2 + $0x108] sm:$0xf]  ;;  %v1499_v26 = vor.u32 %v1965_v14, %v1496_v15  ;;  %v1635_v30 = vor.u32 %v2000_v17, %v1632_v18 }
  0x3e   :  { %801 = vmatpush.bf16.msrb.mxu1 %v1699_v35  ;;  %1772 = vmatmul.msk.bf16.vlgmr.msrb.gmra.mxu0 %vm704_vm1, %v2248_v47  ;;  %v1750_v27 = vld [vmem:[#allocation2 + $0x2e8] sm:$0xf]  ;;  %v1961_v29 = vld [vmem:[#allocation2 + $0xcc] sm:$0xf]  ;;  %v1480_v31 = vld [vmem:[#allocation2 + $0xd8] sm:$0xf0]  ;;  %v1507_v34 = vor.u32 %v1968_v19, %v1504_v22 }
  0x3f   :  { %787 = vmatpush.bf16.msra.mxu0 %v1587_v24  ;;  %1773 = vmatmul.msk.bf16.vlgmr.msrb.gmra.mxu2 %vm704_vm1, %v2248_v47  ;;  %v1971_v24 = vld [vmem:[#allocation2 + $0x114] sm:$0xf0]  ;;  %v2029_v32 = vld [vmem:[#allocation2 + $0x2ec] sm:$0xf]  ;;  %v1752_v33 = vld [vmem:[#allocation2 + $0x2f8] sm:$0xf0]  ;;  %v1483_v42 = vor.u32 %v1961_v29, %v1480_v31 }
  0x40   :  { %839 = vmatpush.bf16.msra.mxu2 %v1591_v28  ;;  %v2031_v28 = vld [vmem:[#allocation2 + $0x2f4] sm:$0xf0]  ;;  %v1766_v35 = vld [vmem:[#allocation2 + $0x308] sm:$0xf]  ;;  %v1511_v37 = vor.u32 %v1971_v24, %v1510_v23  ;;  %v715_v38 = vsel %vm707_vm0, %v602_v25, 0  ;;  %v1755_v43 = vor.u32 %v2029_v32, %v1752_v33 }
  0x41   :  { %828 = vmatpush.bf16.msrb.mxu3 %v1431_v39  ;;  %v1751_v39 = vor.u32 %v2031_v28, %v1750_v27  ;;  %v2027_v41 = vld [vmem:[#allocation2 + $0x2d4] sm:$0xf0]  ;;  %v1957_v44 = vld [vmem:[#allocation2 + $0xac] sm:$0xf]  ;;  %v1624_v46 = vld [vmem:[#allocation2 + $0x1f8] sm:$0xf0] }
  0x42   :  { %802 = vmatpush.bf16.msrb.mxu1 %v1683_v48  ;;  %v1997_v45 = vld [vmem:[#allocation2 + $0x1ec] sm:$0xf]  ;;  %v1464_v48 = vld [vmem:[#allocation2 + $0xb8] sm:$0xf0]  ;;  %v2023_v55 = vld [vmem:[#allocation2 + $0x2b4] sm:$0xf0] }
  0x43   :  { %788 = vmatpush.bf16.msra.mxu0 %v1571_v36  ;;  %v2035_v36 = vld [vmem:[#allocation2 + $0x314] sm:$0xf0]  ;;  %v1736_v50 = vld [vmem:[#allocation2 + $0x2d8] sm:$0xf0]  ;;  %v1467_v56 = vor.u32 %v1957_v44, %v1464_v48  ;;  %v1953_v58 = vld [vmem:[#allocation2 + $0x8c] sm:$0xf] }
  0x44   :  { %840 = vmatpush.bf16.msra.mxu2 %v1575_v40  ;;  %v1734_v40 = vld [vmem:[#allocation2 + $0x2c8] sm:$0xf]  ;;  %v1767_v51 = vor.u32 %v2035_v36, %v1766_v35  ;;  %v1993_v59 = vld [vmem:[#allocation2 + $0x1cc] sm:$0xf]  ;;  %v1720_v2 = vld [vmem:[#allocation2 + $0x2b8] sm:$0xf0] }
  0x45   :  { %829 = vmatpush.bf16.msrb.mxu3 %v1415_v53  ;;  %v1735_v52 = vor.u32 %v2027_v41, %v1734_v40  ;;  %v1627_v53 = vor.u32 %v1997_v45, %v1624_v46  ;;  %v2021_v1 = vld [vmem:[#allocation2 + $0x2ac] sm:$0xf]  ;;  %v2019_v6 = vld [vmem:[#allocation2 + $0x294] sm:$0xf0]  ;;  %v1432_v8 = vld [vmem:[#allocation2 + $0x78] sm:$0xf0] }
  0x46   :  { %803 = vmatpush.bf16.msrb.mxu1 %v1667_v63  ;;  %v1608_v63 = vld [vmem:[#allocation2 + $0x1d8] sm:$0xf0]  ;;  %v1949_v7 = vld [vmem:[#allocation2 + $0x6c] sm:$0xf]  ;;  %v1723_v11 = vor.u32 %v2021_v1, %v1720_v2  ;;  %v1686_v18 = vld [vmem:[#allocation2 + $0x268] sm:$0xf] }
  0x47   :  { %789 = vmatpush.bf16.msra.mxu0 %v1555_v49  ;;  %v2025_v49 = vld [vmem:[#allocation2 + $0x2cc] sm:$0xf]  ;;  %v1611_v5 = vor.u32 %v1993_v59, %v1608_v63  ;;  %v1704_v15 = vld [vmem:[#allocation2 + $0x298] sm:$0xf0]  ;;  %v2015_v19 = vld [vmem:[#allocation2 + $0x274] sm:$0xf0] }
  0x48   :  { %841 = vmatpush.bf16.msra.mxu2 %v1559_v54  ;;  %v1718_v54 = vld [vmem:[#allocation2 + $0x2a8] sm:$0xf]  ;;  %v1739_v57 = vor.u32 %v2025_v49, %v1736_v50  ;;  %v1989_v12 = vld [vmem:[#allocation2 + $0x1ac] sm:$0xf]  ;;  %v1576_v24 = vld [vmem:[#allocation2 + $0x198] sm:$0xf0]  ;;  %v1687_v28 = vor.u32 %v2015_v19, %v1686_v18 }
  0x49   :  { %830 = vmatpush.bf16.msrb.mxu3 %v1399_v3  ;;  %v1702_v3 = vld [vmem:[#allocation2 + $0x288] sm:$0xf]  ;;  %v2017_v14 = vld [vmem:[#allocation2 + $0x28c] sm:$0xf]  ;;  %v1416_v25 = vld [vmem:[#allocation2 + $0x58] sm:$0xf0] }
  0x4a   :  { %804 = vmatpush.bf16.msrb.mxu1 %v1651_v13  ;;  %v1592_v13 = vld [vmem:[#allocation2 + $0x1b8] sm:$0xf0]  ;;  %v1945_v22 = vld [vmem:[#allocation2 + $0x4c] sm:$0xf]  ;;  %v2011_v31 = vld [vmem:[#allocation2 + $0x254] sm:$0xf0] }
  0x4b   :  { %790 = vmatpush.bf16.msra.mxu0 %v1539_v0  ;;  %v1448_v0 = vld [vmem:[#allocation2 + $0x98] sm:$0xf0]  ;;  %v1595_v17 = vor.u32 %v1989_v12, %v1592_v13  ;;  %v1985_v23 = vld [vmem:[#allocation2 + $0x18c] sm:$0xf]  ;;  %v1419_v32 = vor.u32 %v1945_v22, %v1416_v25  ;;  %v2003_v59 = vld [vmem:[#allocation2 + $0x214] sm:$0xf0] }
  0x4c   :  { %842 = vmatpush.bf16.msra.mxu2 %v1543_v4  ;;  %v1719_v4 = vor.u32 %v2023_v55, %v1718_v54  ;;  %v1451_v9 = vor.u32 %v1953_v58, %v1448_v0  ;;  %v1688_v27 = vld [vmem:[#allocation2 + $0x278] sm:$0xf0]  ;;  %v1579_v29 = vor.u32 %v1985_v23, %v1576_v24  ;;  %v1981_v35 = vld [vmem:[#allocation2 + $0x16c] sm:$0xf]  ;;  %v2038_v19 = vld [vmem:[#allocation5 + $0x10] sm:$0xff] }
  0x4d   :  { %831 = vmatpush.bf16.msrb.mxu3 %v1383_v20  ;;  %v1435_v20 = vor.u32 %v1949_v7, %v1432_v8  ;;  %v1560_v36 = vld [vmem:[#allocation2 + $0x178] sm:$0xf0]  ;;  %v1937_v46 = vld [vmem:[#allocation2 + $0xc] sm:$0xf]  ;;  %v2048_v22 = vld [vmem:[#allocation5 + $0x60] sm:$0xff] }
  0x4e   :  { %805 = vmatpush.bf16.msrb.mxu1 %v1635_v30  ;;  %v1670_v30 = vld [vmem:[#allocation2 + $0x248] sm:$0xf]  ;;  %v1563_v41 = vor.u32 %v1981_v35, %v1560_v36  ;;  %v1977_v48 = vld [vmem:[#allocation2 + $0x14c] sm:$0xf]  ;;  %v1544_v49 = vld [vmem:[#allocation2 + $0x158] sm:$0xf0] }
  0x4f   :  { %791 = vmatpush.bf16.msra.mxu0 %v1523_v16  ;;  %v1703_v16 = vor.u32 %v2019_v6, %v1702_v3  ;;  %v1671_v40 = vor.u32 %v2011_v31, %v1670_v30  ;;  %v1384_v50 = vld [vmem:[#allocation2 + $0x18] sm:$0xf0]  ;;  %v1547_v55 = vor.u32 %v1977_v48, %v1544_v49  ;;  %v1973_v63 = vld [vmem:[#allocation2 + $0x12c] sm:$0xf]  ;;  %v2275_v24 = vld [vmem:[%s2316_s2] sm:$0xf] }
  0x50   :  { %843 = vmatpush.bf16.msra.mxu2 %v1527_v21  ;;  %832 = vmatmul.bf16.vlgmr.msrb.gmra.mxu3 %v2238_v61  ;;  %v1707_v21 = vor.u32 %v2017_v14, %v1704_v15  ;;  %v1528_v0 = vld [vmem:[#allocation2 + $0x138] sm:$0xf0]  ;;  %v2001_v1 = vld [vmem:[#allocation2 + $0x20c] sm:$0xf]  ;;  %v2046_v25 = vld [vmem:[#allocation5 + $0x50] sm:$0xff] }
  0x51   :  { %876 = vmatpush.bf16.msra.mxu3 %v1499_v26  ;;  %806 = vmatmul.bf16.vlgmr.msrb.gmra.mxu1 %v2240_v62  ;;  %v2013_v26 = vld [vmem:[#allocation2 + $0x26c] sm:$0xf]  ;;  %v1640_v2 = vld [vmem:[#allocation2 + $0x218] sm:$0xf0]  ;;  %v2058_v36 = vld [vmem:[#allocation5 + $0xb0] sm:$0xff] }
  0x52   :  { %869 = vmatpush.bf16.msra.mxu1 %v715_v38  ;;  %v1691_v33 = vor.u32 %v2013_v26, %v1688_v27  ;;  %v2009_v38 = vld [vmem:[#allocation2 + $0x24c] sm:$0xf]  ;;  %v1643_v6 = vor.u32 %v2001_v1, %v1640_v2  ;;  %v1512_v8 = vld [vmem:[#allocation2 + $0x118] sm:$0xf0]  ;;  %v168_v26 = vperm.slane %v2275_v24, 0  ;;  %v2052_v2 = vld [vmem:[#allocation5 + $0x80] sm:$0xff] }
  0x53   :  { %792 = vmatpush.bf16.msra.mxu0 %v1507_v34  ;;  %v1941_v34 = vld [vmem:[#allocation2 + $0x2c] sm:$0xf]  ;;  %v1768_v13 = vld [vmem:[#allocation2 + $0x318] sm:$0xf0] }
  0x54   :  { %844 = vmatpush.bf16.msra.mxu2 %v1511_v37  ;;  %v1400_v37 = vld [vmem:[#allocation2 + $0x38] sm:$0xf0]  ;;  %v2043_v3 = vld [vmem:[#allocation5 + $0x38] sm:$0xff] }
  0x55   :  { %877 = vmatpush.bf16.msra.mxu3 %v1483_v42  ;;  %v1654_v42 = vld [vmem:[#allocation2 + $0x228] sm:$0xf]  ;;  %v1403_v44 = vor.u32 %v1941_v34, %v1400_v37  ;;  %v1969_v7 = vld [vmem:[#allocation2 + $0x10c] sm:$0xf] }
  0x56   :  { %793 = vmatmul.bf16.vlgmr.msra.gmra.mxu0 %v2244_v10  ;;  %870 = vmatpush.bf16.msra.mxu1 %v1767_v51  ;;  %v2005_v51 = vld [vmem:[#allocation2 + $0x22c] sm:$0xf]  ;;  %v1515_v14 = vor.u32 %v1969_v7, %v1512_v8 }
  0x57   :  { %850 = vmatpush.bf16.msrb.mxu0 %v1751_v39  ;;  %845 = vmatmul.bf16.vlgmr.msra.gmra.mxu2 %v2244_v10  ;;  %v1672_v39 = vld [vmem:[#allocation2 + $0x258] sm:$0xf0]  ;;  %v2033_v12 = vld [vmem:[#allocation2 + $0x30c] sm:$0xf] }
  0x58   :  { %902 = vmatpush.bf16.msrb.mxu2 %v1755_v43  ;;  %v2007_v43 = vld [vmem:[#allocation2 + $0x234] sm:$0xf0]  ;;  %v1675_v45 = vor.u32 %v2009_v38, %v1672_v39  ;;  %v1771_v15 = vor.u32 %v2033_v12, %v1768_v13  ;;  %v2051_v18 = vld [vmem:[#allocation5 + $0x78] sm:$0xff] }
  0x59   :  { %878 = vmatpush.bf16.msra.mxu3 %v1467_v56  ;;  %v1655_v54 = vor.u32 %v2007_v43, %v1654_v42  ;;  %v1638_v56 = vld [vmem:[#allocation2 + $0x208] sm:$0xf]  ;;  %v2057_v38 = vld [vmem:[#allocation5 + $0xa8] sm:$0xff]  ;;  %v2056_v43 = vld [vmem:[#allocation5 + $0xa0] sm:$0xff] }
  0x5a   :  { %889 = vmatpush.bf16.msrb.mxu1 %v1627_v53  ;;  %v499_v53 = vunpack.c.h.b16 %v2254_v60  ;;  %v1531_v60 = vor.u32 %v1973_v63, %v1528_v0  ;;  %v2055_v49 = vld [vmem:[#allocation5 + $0x98] sm:$0xff]  ;;  %v2064_v0 = vld [vmem:[#allocation5 + $0xe0] sm:$0xff]  ;;  %v2061_v13 = vld [vmem:[#allocation5 + $0xc8] sm:$0xff] }
  0x5b   :  { %851 = vmatpush.bf16.msrb.mxu0 %v1735_v52  ;;  %v1656_v52 = vld [vmem:[#allocation2 + $0x238] sm:$0xf0] }
  0x5c   :  { %903 = vmatpush.bf16.msrb.mxu2 %v1739_v57  ;;  %v1387_v57 = vor.u32 %v1937_v46, %v1384_v50  ;;  %v1659_v58 = vor.u32 %v2005_v51, %v1656_v52  ;;  %v2066_v52 = vld [vmem:[#allocation5 + $0xf0] sm:$0xff] }
  0x5d   :  { %879 = vmatpush.bf16.msra.mxu3 %v1451_v9  ;;  %v2042_v9 = vld [vmem:[#allocation5 + $0x30] sm:$0xff] }
  0x5e   :  { %890 = vmatpush.bf16.msrb.mxu1 %v1611_v5  ;;  %v1639_v5 = vor.u32 %v2003_v59, %v1638_v56 }
  0x5f   :  { %852 = vmatpush.bf16.msrb.mxu0 %v1719_v4  ;;  %v603_v4 = vpack.c.b16 %v499_v53, %v499_v53  ;;  %v2054_v53 = vld [vmem:[#allocation5 + $0x90] sm:$0xff] }
  0x60   :  { %904 = vmatpush.bf16.msrb.mxu2 %v1723_v11 }
  0x61   :  { %880 = vmatpush.bf16.msra.mxu3 %v1435_v20  ;;  %1774 = vmatmul.msk.bf16.vlgmr.msra.gmra.mxu1 %vm704_vm1, %v2248_v47  ;;  %v718_v11 = vsel %vm707_vm0, %v603_v4, 0  ;;  %v2037_v20 = vld [vmem:[#allocation5 + $0x8] sm:$0xff]  ;;  %v2063_v4 = vld [vmem:[#allocation5 + $0xd8] sm:$0xff] }
  0x62   :  { %891 = vmatpush.bf16.msrb.mxu1 %v1595_v17  ;;  %v2039_v17 = vld [vmem:[#allocation5 + $0x18] sm:$0xff] }
  0x63   :  { %853 = vmatpush.bf16.msrb.mxu0 %v1703_v16  ;;  %v2041_v16 = vld [vmem:[#allocation5 + $0x28] sm:$0xff] }
  0x64   :  { %905 = vmatpush.bf16.msrb.mxu2 %v1707_v21  ;;  %v2036_v21 = vld [vmem:[#allocation5] sm:$0xff] }
  0x65   :  { %881 = vmatpush.bf16.msra.mxu3 %v1419_v32  ;;  %v2059_v32 = vld [vmem:[#allocation5 + $0xb8] sm:$0xff] }
  0x66   :  { %892 = vmatpush.bf16.msrb.mxu1 %v1579_v29 }
  0x67   :  { %854 = vmatpush.bf16.msrb.mxu0 %v1687_v28  ;;  %v2045_v28 = vld [vmem:[#allocation5 + $0x48] sm:$0xff] }
  0x68   :  { %906 = vmatpush.bf16.msrb.mxu2 %v1691_v33  ;;  %v2044_v33 = vld [vmem:[#allocation5 + $0x40] sm:$0xff] }
  0x69   :  { %882 = vmatpush.bf16.msra.mxu3 %v1403_v44  ;;  %v2067_v44 = vld [vmem:[#allocation5 + $0xf8] sm:$0xff] }
  0x6a   :  { %893 = vmatpush.bf16.msrb.mxu1 %v1563_v41 }
  0x6b   :  { %855 = vmatpush.bf16.msrb.mxu0 %v1671_v40 }
  0x6c   :  { %907 = vmatpush.bf16.msrb.mxu2 %v1675_v45 }
  0x6d   :  { %883 = vmatpush.bf16.msra.mxu3 %v1387_v57 }
  0x6e   :  { %894 = vmatpush.bf16.msrb.mxu1 %v1547_v55  ;;  %v2065_v55 = vld [vmem:[#allocation5 + $0xe8] sm:$0xff] }
  0x6f   :  { %856 = vmatpush.bf16.msrb.mxu0 %v1655_v54  ;;  %v169_v54 = vperm.slane %v2275_v24, 1 }
  0x70   :  { %908 = vmatpush.bf16.msrb.mxu2 %v1659_v58  ;;  %884 = vmatmul.bf16.vlgmr.msra.gmra.mxu3 %v2238_v61  ;;  %v2040_v61 = vld [vmem:[#allocation5 + $0x20] sm:$0xff]  ;;  %v2053_v58 = vld [vmem:[#allocation5 + $0x88] sm:$0xff] }
  0x71   :  { %1196 = vmatpush.bf16.msrb.mxu3 %v2043_v3 }
  0x72   :  { %895 = vmatpush.bf16.msrb.mxu1 %v1531_v60 }
  0x73   :  { %857 = vmatpush.bf16.msrb.mxu0 %v1639_v5 }
  0x74   :  { %909 = vmatpush.bf16.msrb.mxu2 %v1643_v6 }
  0x75   :  { %1197 = vmatpush.bf16.msrb.mxu3 %v2042_v9  ;;  %v2062_v9 = vld [vmem:[#allocation5 + $0xd0] sm:$0xff] }
  0x76   :  { %858 = vmatmul.bf16.vlgmr.msrb.gmra.mxu0 %v2240_v62  ;;  %896 = vmatpush.bf16.msrb.mxu1 %v1515_v14 }
  0x77   :  { %921 = vmatpush.bf16.msra.mxu0 %v718_v11  ;;  %910 = vmatmul.bf16.vlgmr.msrb.gmra.mxu2 %v2240_v62  ;;  %v2050_v62 = vld [vmem:[#allocation5 + $0x70] sm:$0xff] }
  0x78   :  { %1235 = vmatpush.bf16.msra.mxu2 %v2067_v44 }
  0x79   :  { %897 = vmatmul.bf16.vlgmr.msrb.gmra.mxu1 %v2244_v10  ;;  %1198 = vmatpush.bf16.msrb.mxu3 %v2041_v16  ;;  %v2049_v10 = vld [vmem:[#allocation5 + $0x68] sm:$0xff]  ;;  %v2060_v16 = vld [vmem:[#allocation5 + $0xc0] sm:$0xff] }
  0x7a   :  { %1222 = vmatpush.bf16.msra.mxu1 %v2059_v32 }
  0x7b   :  { %922 = vmatpush.bf16.msra.mxu0 %v1771_v15 }
  0x7c   :  { %1236 = vmatpush.bf16.msra.mxu2 %v2066_v52 }
  0x7d   :  { %1199 = vmatpush.bf16.msrb.mxu3 %v2040_v61 }
  0x7e   :  { %1223 = vmatpush.bf16.msra.mxu1 %v2058_v36 }
  0x7f   :  { %1209 = vmatpush.bf16.msrb.mxu0 %v2051_v18 }
  0x80   :  { %1237 = vmatpush.bf16.msra.mxu2 %v2065_v55 }
  0x81   :  { %1200 = vmatpush.bf16.msrb.mxu3 %v2039_v17  ;;  %v170_v17 = vperm.slane %v2275_v24, 2 }
  0x82   :  { %1224 = vmatpush.bf16.msra.mxu1 %v2057_v38 }
  0x83   :  { %1210 = vmatpush.bf16.msrb.mxu0 %v2050_v62 }
  0x84   :  { %1238 = vmatpush.bf16.msra.mxu2 %v2064_v0 }
  0x85   :  { %1201 = vmatpush.bf16.msrb.mxu3 %v2038_v19 }
  0x86   :  { %1775 = vmatmul.msk.bf16.vlgmr.msra.gmra.mxu0 %vm704_vm1, %v2248_v47  ;;  %v2047_v47 = vld [vmem:[#allocation5 + $0x58] sm:$0xff]  ;;  %1225 = vmatpush.bf16.msra.mxu1 %v2056_v43  ;;  %v2073_v43 = vld [vmem:[%s2319_s5 + $0x28] sm:$0xff] }
  0x87   :  { %1211 = vmatpush.bf16.msrb.mxu0 %v2049_v10  ;;  %v171_v10 = vperm.slane %v2275_v24, 3 }
  0x88   :  { %1239 = vmatpush.bf16.msra.mxu2 %v2063_v4 }
  0x89   :  { %1202 = vmatpush.bf16.msrb.mxu3 %v2037_v20 }
  0x8a   :  { %1226 = vmatpush.bf16.msra.mxu1 %v2055_v49  ;;  %v2070_v49 = vld [vmem:[%s2319_s5 + $0x10] sm:$0xff] }
  0x8b   :  { %1212 = vmatpush.bf16.msrb.mxu0 %v2048_v22 }
  0x8c   :  { %1240 = vmatpush.bf16.msra.mxu2 %v2062_v9 }
  0x8d   :  { %1203 = vmatpush.bf16.msrb.mxu3 %v2036_v21 }
  0x8e   :  { %1227 = vmatpush.bf16.msra.mxu1 %v2054_v53 }
  0x8f   :  { %1213 = vmatpush.bf16.msrb.mxu0 %v2047_v47 }
  0x90   :  { %1241 = vmatpush.bf16.msra.mxu2 %v2061_v13 }
  0x92   :  { %1228 = vmatpush.bf16.msra.mxu1 %v2053_v58 }
  0x93   :  { %1214 = vmatpush.bf16.msrb.mxu0 %v2046_v25 }
  0x94   :  { %1242 = vmatpush.bf16.msra.mxu2 %v2060_v16 }
  0x96   :  { %1229 = vmatpush.bf16.msra.mxu1 %v2052_v2  ;;  %v2086_v2 = vld [vmem:[%s2320_s6] ss:$0 sm:$0xff] }
  0x97   :  { %1215 = vmatpush.bf16.msrb.mxu0 %v2045_v28 }
  0x9b   :  { %1216 = vmatpush.bf16.msrb.mxu0 %v2044_v33 }
  0xab   :  { %v729_v23 = vpop.f32.mrf.mxu0 }
  0xac   :  { %v730_v30 = vadd.f32 %v729_v23, %v168_v26 }
  0xae   :  { %v742_v27 = vpop.f32.mrf.mxu1 }
  0xaf   :  { %v743_v35 = vadd.f32 %v742_v27, %v730_v30 }
  0xb2   :  { %v755_v29 = vpop.f32.mrf.mxu2 }
  0xb3   :  { %v731_v31 = vpop.f32.mrf.mxu0  ;;  %v781_v34 = vpop.f32.mrf.mxu3  ;;  %v756_v40 = vadd.f32 %v755_v29, %v743_v35 }
  0xb4   :  { %v782_v56 = vadd.f32 %v781_v34, %v169_v54  ;;  %v2085_v54 = vld [vmem:[%s2318_s4] ss:$0 sm:$0xff] }
  0xb6   :  { %v744_v37 = vpop.f32.mrf.mxu1 }
  0xba   :  { %v757_v39 = vpop.f32.mrf.mxu2 }
  0xbb   :  { %v768_v41 = vpop.f32.mrf.mxu0  ;;  %v783_v45 = vpop.f32.mrf.mxu3  ;;  %v2075_v39 = vld [vmem:[%s2319_s5 + $0x38] sm:$0xff] }
  0xbc   :  { %v769_v42 = vadd.f32 %v768_v41, %v756_v40  ;;  %1318 = vmatpush.bf16.msra.mxu3 %v2075_v39  ;;  %v2072_v45 = vld [vmem:[%s2319_s5 + $0x20] sm:$0xff] }
  0xbe   :  { %v928_v46 = vmax.f32 %v769_v42, 0.0  ;;  %v2074_v42 = vld [vmem:[%s2319_s5 + $0x30] sm:$0xff] }
  0xc0   :  { %v932_v48 = vpack.c.bf16 %v928_v46, %v928_v46  ;;  %1319 = vmatpush.bf16.msra.mxu3 %v2074_v42  ;;  %v2071_v46 = vld [vmem:[%s2319_s5 + $0x18] sm:$0xff] }
  0xc2   :  { %v820_v50 = vpop.f32.mrf.mxu2  ;;  %1204 = vmatmul.bf16.vlgmr.msrb.gmra.mxu3 %v932_v48 }
  0xc3   :  { %v770_v51 = vpop.f32.mrf.mxu0 }
  0xc4   :  { %1320 = vmatpush.bf16.msra.mxu3 %v2073_v43  ;;  %v2068_v51 = vld [vmem:[%s2319_s5] sm:$0xff] }
  0xc8   :  { %1321 = vmatpush.bf16.msra.mxu3 %v2072_v45 }
  0xca   :  { %v822_v57 = vpop.f32.mrf.mxu2 }
  0xcc   :  { %1322 = vmatpush.bf16.msra.mxu3 %v2071_v46 }
  0xce   :  { %v807_v63 = vpop.f32.mrf.mxu1 }
  0xd0   :  { %1323 = vmatpush.bf16.msra.mxu3 %v2070_v49 }
  0xd3   :  { %v794_v59 = vpop.f32.mrf.mxu0  ;;  %v833_v6 = vpop.f32.mrf.mxu3 }
  0xd4   :  { %v795_v1 = vadd.f32 %v794_v59, %v782_v56  ;;  %v834_v18 = vadd.f32 %v833_v6, %v170_v17 }
  0xd6   :  { %v808_v3 = vadd.f32 %v807_v63, %v795_v1  ;;  %v809_v7 = vpop.f32.mrf.mxu1 }
  0xd8   :  { %v821_v5 = vadd.f32 %v820_v50, %v808_v3  ;;  %v2069_v50 = vld [vmem:[%s2319_s5 + $0x8] sm:$0xff] }
  0xd9   :  { %1324 = vmatpush.bf16.msra.mxu3 %v2069_v50 }
  0xda   :  { %v929_v60 = vmax.f32 %v821_v5, 0.0  ;;  %v846_v12 = vpop.f32.mrf.mxu2 }
  0xdb   :  { %v796_v8 = vpop.f32.mrf.mxu0  ;;  %v835_v14 = vpop.f32.mrf.mxu3  ;;  %v847_v20 = vadd.f32 %v846_v12, %v834_v18 }
  0xdc   :  { %v933_v11 = vpack.c.bf16 %v929_v60, %v929_v60 }
  0xdd   :  { %1325 = vmatpush.bf16.msra.mxu3 %v2068_v51 }
  0xde   :  { %1217 = vmatmul.bf16.vlgmr.msrb.gmra.mxu0 %v933_v11  ;;  %v872_v15 = vpop.f32.mrf.mxu1 }
  0xe2   :  { %v848_v61 = vpop.f32.mrf.mxu2 }
  0xe6   :  { %v874_v19 = vpop.f32.mrf.mxu1 }
  0xf3   :  { %v859_v62 = vpop.f32.mrf.mxu0  ;;  %v885_v47 = vpop.f32.mrf.mxu3 }
  0xf4   :  { %v860_v21 = vadd.f32 %v859_v62, %v847_v20  ;;  %v886_v25 = vadd.f32 %v885_v47, %v171_v10 }
  0xf6   :  { %v873_v22 = vadd.f32 %v872_v15, %v860_v21  ;;  %v898_v26 = vpop.f32.mrf.mxu1 }
  0xf7   :  { %v899_v30 = vadd.f32 %v898_v26, %v886_v25 }
  0xf8   :  { %v930_v23 = vmax.f32 %v873_v22, 0.0 }
  0xfa   :  { %v934_v27 = vpack.c.bf16 %v930_v23, %v930_v23  ;;  %v911_v28 = vpop.f32.mrf.mxu2 }
  0xfb   :  { %v861_v29 = vpop.f32.mrf.mxu0  ;;  %v887_v31 = vpop.f32.mrf.mxu3  ;;  %v912_v32 = vadd.f32 %v911_v28, %v899_v30 }
  0xfc   :  { %1230 = vmatmul.bf16.vlgmr.msra.gmra.mxu1 %v934_v27 }
  0xfe   :  { %v900_v33 = vpop.f32.mrf.mxu1 }
 0x102   :  { %v913_v34 = vpop.f32.mrf.mxu2 }
 0x103   :  { %v924_v35 = vpop.f32.mrf.mxu0 }
 0x104   :  { %v925_v36 = vadd.f32 %v924_v35, %v912_v32 }
 0x106   :  { %v931_v37 = vmax.f32 %v925_v36, 0.0 }
 0x108   :  { %v935_v38 = vpack.c.bf16 %v931_v37, %v931_v37 }
 0x10a   :  { %1243 = vmatmul.bf16.vlgmr.msra.gmra.mxu2 %v935_v38 }
 0x10b   :  { %v926_v24 = vpop.f32.mrf.mxu0 }
 0x145   :  { %v1205_v40 = vpop.f32.mrf.mxu3 }
 0x146   :  { %v1206_v55 = vadd.f32 %v2085_v54, %v1205_v40 }
 0x14d   :  { %v1207_v41 = vpop.f32.mrf.mxu3 }
 0x15b   :  { %v1218_v44 = vpop.f32.mrf.mxu0 }
 0x15c   :  { %v1219_v56 = vadd.f32 %v1218_v44, %v1206_v55 }
 0x163   :  { %v1220_v48 = vpop.f32.mrf.mxu0 }
 0x179   :  { %v1231_v52 = vpop.f32.mrf.mxu1 }
 0x17a   :  { %v1232_v57 = vadd.f32 %v1231_v52, %v1219_v56 }
 0x181   :  { %v1233_v53 = vpop.f32.mrf.mxu1 }
 0x18d   :  { %v1244_v58 = vpop.f32.mrf.mxu2 }
 0x18e   :  { %v1245_v59 = vadd.f32 %v1244_v58, %v1232_v57 }
 0x190   :  { %v1248_v63 = vmax.f32 %v1245_v59, 0.0 }
 0x192   :  { %v1249_v0 = vpack.c.bf16 %v1248_v63, %v1248_v63 }
 0x194   :  { %1326 = vmatmul.bf16.vlgmr.msra.gmra.mxu3 %v1249_v0 }
 0x195   :  { %v1246_v1 = vpop.f32.mrf.mxu2 }
 0x217   :  { %v1327_v3 = vpop.f32.mrf.mxu3 }
 0x218   :  { %v1328_v4 = vadd.f32 %v2086_v2, %v1327_v3 }
 0x21a   :  { %v1331_v5 = vsub.f32 0.0, %v1328_v4 }
 0x21c   :  { %v1332_v60 = vmul.f32 1.442695, %v1331_v5 }
 0x21e   :  { %2087 = vpow2.f32 %v1332_v60 }
 0x21f   :  { %v1329_v6 = vpop.f32.mrf.mxu3 }
 0x224   :  { %v2088_v7 = vpop.eup %2087 }
 0x225   :  { %v1334_v8 = vadd.f32 1.0, %v2088_v7 }
 0x227   :  { %2089 = vrcp.f32 %v1334_v8  ;;  %v1346_v13 = vand.u32 2147483648, %v1334_v8  ;;  %v1344_v15 = vand.u32 2147483647, %v1334_v8  ;;  %vm1340_vm3 = vweird.f32 %v1334_v8 }
 0x229   :  { %v1347_v61 = vor.u32 1.1754944e-38, %v1346_v13  ;;  %vm1345_vm6 = vcmp.eq.f32.partialorder %v1344_v15, 8.507059e+37 }
 0x22d   :  { %v2090_v9 = vpop.eup %2089 }
 0x22e   :  { %v1336_v11 = vmul.f32 %v2090_v9, %v1334_v8  ;;  %vm1341_vm2 = vweird.f32 %v2090_v9 }
 0x22f   :  { %vm1342_vm4 = vmor %vm1340_vm3, %vm1341_vm2 }
 0x230   :  { %v1337_v12 = vsub.f32 1.0, %v1336_v11 }
 0x232   :  { %v1338_v14 = vmul.f32 %v2090_v9, %v1337_v12 }
 0x234   :  { %v1339_v16 = vadd.f32 %v2090_v9, %v1338_v14 }
 0x236   :  { %v1343_v17 = vsel %vm1342_vm4, %v2090_v9, %v1339_v16 }
 0x237   :  { %v1348_v18 = vsel %vm1345_vm6, %v1347_v61, %v1343_v17 }
 0x238   :  { %1351 = vst.msk [vmem:[#allocation7] sm:$0xff] %vm1350_vm5, %v1348_v18 }
 0x239   :  { %1355 = vsyncadd [#allocation4], 96  ;;  %s1358_s6 = sshll.u32 %s2321_s7, 4  ;;  %s2175_s16 = smov [#allocation7]   ;;  %s1359_s6 = int_to_ptr.hbm [resolvable:$true] %s1358_s6 }
 0x23a   :  { %s1356_s17 = sshll.u32 %s2175_s16, 4  ;;  %s2176_s18 = smov 32   ;;  %s1357_s17 = int_to_ptr.vmem [resolvable:$true] %s1356_s17 }
 0x23b   :  { %s2177_s19 = smov 2  }
 0x23c   :  { %1364 = dma.vmem_to_hbm [thread:$0]  %s1357_s17, 32, %s1359_s6, [#allocation4], %s2176_s18, %s2176_s18, %s2177_s19  }
 0x23d   :  { %2167 = dma.done.wait [#allocation4], 128  }
 0x23e   :  { %2168 = vsyncadd [#allocation4], 4294967168 }
 0x23f   :  { %1369 = vsyncpa [#allocation3], 1 }
 0x240   :  { %1370 = vsyncpa [#allocation6], 1 }
 0x241   :  { %1371 = vsyncpa [#allocation4], 1 }

</bundles_post_ra>
